<compile_context>
chip_gen: v5e
topology: v5e:2x2
jax: 0.10.0
libtpu: 0.0.40
codegen_flags: <defaults>
</compile_context>

<pallas_src>
import math

import jax
import jax.numpy as jnp
from jax.experimental import pallas as pl
from jax.experimental.pallas import tpu as pltpu


def _copy_kernel(x_ref, o_ref):
    # Pure data movement: one lane-dense (tr, c) tile in, same tile out.
    o_ref[...] = x_ref[...]


# Packed minimum sublane unit per itemsize (f32 -> 8, bf16/f16 -> 16, int8 -> 32).
_SUBLANE_UNIT = {4: 8, 2: 16, 1: 32}

_LANE_MAX = 4096                  # lane-width cap for the slab
_BLOCK_BYTES = 2 * 1024 * 1024    # ~2 MiB per block; 2 operands x 2 buffers = 8 MiB


def _copy_flat(flat):
    """HBM-bandwidth-bound materializing copy of a 1-D array via Pallas."""
    n = flat.shape[0]
    itemsize = jnp.dtype(flat.dtype).itemsize
    unit = _SUBLANE_UNIT.get(itemsize, 8)

    # Pad to a lane-dense length: multiple of 128 and at least one full
    # (unit, 128) packed tile. Typical NN shapes need no padding at all.
    n_padded = max(pl.cdiv(n, 128) * 128, 128 * unit)
    if n_padded != n:
        flat = jnp.pad(flat, (0, n_padded - n))

    # Slab (rows, c): grow c (power-of-two multiple of 128) while it divides
    # n_padded and keeps rows >= unit, so blocks stay legal packed tiles.
    c = 128
    while (c * 2 <= _LANE_MAX and n_padded % (c * 2) == 0
           and n_padded // (c * 2) >= unit):
        c *= 2
    rows = n_padded // c

    # Row tile: a multiple of `unit`, sized so one block is ~_BLOCK_BYTES and
    # spans the full lane width => each block is one contiguous HBM burst.
    tr_cap = max(unit, (_BLOCK_BYTES // (c * itemsize)) // unit * unit)
    tr = min(tr_cap, (rows // unit) * unit)
    grid_r = pl.cdiv(rows, tr)      # partial last block is masked on store

    # Deeper buffering only pays off for small blocks with enough grid steps.
    spec_kwargs = {}
    if tr * c * itemsize < 512 * 1024 and grid_r >= 3:
        spec_kwargs["pipeline_mode"] = pl.Buffered(3)

    x2d = flat.reshape(rows, c)     # metadata-only
    out2d = pl.pallas_call(
        _copy_kernel,
        out_shape=jax.ShapeDtypeStruct((rows, c), flat.dtype),
        grid=(grid_r,),
        in_specs=[pl.BlockSpec((tr, c), lambda i: (i, 0), **spec_kwargs)],
        out_specs=pl.BlockSpec((tr, c), lambda i: (i, 0), **spec_kwargs),
        compiler_params=pltpu.CompilerParams(
            dimension_semantics=("parallel",)),
    )(x2d)

    out = out2d.reshape(n_padded)
    if n_padded != n:
        out = out[:n]
    return out


def _materialized_reshape(x, out_shape):
    out_shape = tuple(int(d) for d in out_shape)
    if x.size == 0:
        return x.reshape(out_shape)
    return _copy_flat(x.reshape(-1)).reshape(out_shape)


def reshape_flatten(x, *, materialize=False):
    """Reshape.forward: X.view(X.shape[0], -1).

    Default (materialize=False): metadata-only XLA reshape -- zero HBM traffic,
    no kernel launch. materialize=True routes the data through the Pallas copy.
    """
    out_shape = (x.shape[0], math.prod(x.shape[1:]) if x.ndim > 1 else 1)
    if not materialize:
        return x.reshape(out_shape)
    return _materialized_reshape(x, out_shape)


def reshape_lrp(r, in_shape, *, materialize=False):
    """Reshape.pattern_LRP: R.view(in_shape)."""
    in_shape = tuple(int(d) for d in in_shape)
    if not materialize:
        return r.reshape(in_shape)
    return _materialized_reshape(r, in_shape)


if __name__ == "__main__":
    key = jax.random.PRNGKey(0)
    # Small NCHW input: batch=2, channels=4, spatial=16x16 (flat = 1024).
    x = jax.random.normal(key, (2, 4, 16, 16), dtype=jnp.float32)
    ref = x.reshape(x.shape[0], -1)

    # Default path: metadata-only reshape (no kernel, no HBM round trip).
    y_free = jax.block_until_ready(reshape_flatten(x))
    assert y_free.shape == (2, 4 * 16 * 16)
    assert jnp.array_equal(y_free, ref)

    # Materialized path: run the Pallas copy kernel once.
    y = jax.block_until_ready(reshape_flatten(x, materialize=True))
    assert y.shape == (2, 4 * 16 * 16)
    assert y.dtype == x.dtype
    assert jnp.array_equal(y, ref)

    # Round-trip via the LRP path (R.view(in_shape)) through the kernel.
    x_back = jax.block_until_ready(reshape_lrp(y, x.shape, materialize=True))
    assert x_back.shape == x.shape
    assert jnp.array_equal(x_back, x)

    # Ragged, packed-dtype case: exercises padding + dtype-aware sublane unit.
    xb = jax.random.normal(jax.random.PRNGKey(1), (2, 3, 5, 7)).astype(jnp.bfloat16)
    yb = jax.block_until_ready(reshape_flatten(xb, materialize=True))
    assert yb.shape == (2, 3 * 5 * 7)
    assert jnp.array_equal(yb, xb.reshape(2, -1))

    print("KERNEL_OK")
</pallas_src>

<mosaic_0001>
module attributes {stable_mosaic.version = 11 : i64} {
  func.func @_copy_kernel(%arg0: i32, %arg1: memref<8x256xf32, #tpu.memory_space<vmem>>, %arg2: memref<8x256xf32, #tpu.memory_space<vmem>>) attributes {dimension_semantics = [#tpu.dimension_semantics<parallel>], iteration_bounds = array<i64: 1>, scalar_prefetch = 0 : i64, scratch_operands = 0 : i64, tpu.core_type = #tpu.core_type<tc>, window_params = [{transform_indices = @transform_0, window_bounds = array<i64: 8, 256>}, {transform_indices = @transform_1, window_bounds = array<i64: 8, 256>}]} {
    %c0 = arith.constant 0 : index
    %c0_0 = arith.constant 0 : index
    %0 = vector.load %arg1[%c0, %c0_0] : memref<8x256xf32, #tpu.memory_space<vmem>>, vector<8x256xf32>
    %c0_1 = arith.constant 0 : index
    %c0_2 = arith.constant 0 : index
    %1 = vector.load %arg2[%c0_1, %c0_2] : memref<8x256xf32, #tpu.memory_space<vmem>>, vector<8x256xf32>
    tpu.vector_store %arg2[%c0_1, %c0_2], %0 {strides = array<i32>} : memref<8x256xf32, #tpu.memory_space<vmem>>, vector<8x256xf32>,
    return
  }
  func.func @transform_0(%arg0: i32) -> (i32, i32) {
    %c0_i32 = arith.constant 0 : i32
    %c0_i32_0 = arith.constant 0 : i32
    return %arg0, %c0_i32 : i32, i32
  }
  func.func @transform_1(%arg0: i32) -> (i32, i32) {
    %c0_i32 = arith.constant 0 : i32
    %c0_i32_0 = arith.constant 0 : i32
    return %arg0, %c0_i32 : i32, i32
  }
}

</mosaic_0001>

<bundles_post_ra>
// kernel: tpu_custom_call.1
= control target key start
LH: loop header
LB: loop body
LE: loop exit
PB: predicated region body
PF: predicated region fallthrough
CT: control target
= control target key end

     0   :  { %6 = vsyncpa [#allocation3], 0  ;;  %s116_s0 = inlined_call_operand.hbm [shape: f32[8,256], index: 0, kind: input, shape index: {}]   ;;  %s117_s1 = inlined_call_operand.hbm [shape: f32[8,256], index: 1, kind: output, shape index: {}]  }
   0x1   :  { %7 = vsyncpa [#allocation4], 0  ;;  %s13_s8 = sshll.u32 %s116_s0, 4  ;;  %s98_s9 = smov [#allocation2]   ;;  %s14_s8 = int_to_ptr.hbm [resolvable:$true] %s13_s8 }
   0x2   :  { %s15_s10 = sshll.u32 %s98_s9, 4  ;;  %s16_s10 = int_to_ptr.vmem [resolvable:$true] %s15_s10 }
   0x3   :  { %18 = dma.hbm_to_vmem [thread:$0]  %s14_s8, 256, %s16_s10, [#allocation3]  }
   0x4   :  { %94 = dma.done.wait [#allocation3], 256  }
   0x5   :  { %95 = vsyncadd [#allocation3], 4294967040  ;;  %s99_s11 = smov [#allocation5]   ;;  %s34_s15 = sshll.u32 %s117_s1, 4  ;;  %v23_v0 = vld [vmem:[#allocation2] sm:$0xff]  ;;  %v24_v1 = vld [vmem:[#allocation2 + $0x8] sm:$0xff]  ;;  %s35_s15 = int_to_ptr.hbm [resolvable:$true] %s34_s15 }
   0x6   :  { %s32_s12 = sshll.u32 %s99_s11, 4  ;;  %25 = vst [vmem:[#allocation5] sm:$0xff] %v23_v0  ;;  %s33_s12 = int_to_ptr.vmem [resolvable:$true] %s32_s12 }
   0x7   :  { %26 = vst [vmem:[#allocation5 + $0x8] sm:$0xff] %v24_v1 }
   0x8   :  { %37 = dma.vmem_to_hbm [thread:$0]  %s33_s12, 256, %s35_s15, [#allocation4]  }
   0x9   :  { %96 = dma.done.wait [#allocation4], 256  }
   0xa   :  { %97 = vsyncadd [#allocation4], 4294967040 }
   0xb   :  { %42 = vsyncpa [#allocation3], 1 }
   0xc   :  { %43 = vsyncpa [#allocation4], 1 }

</bundles_post_ra>
